<compile_context>
chip_gen: v6e
topology: v6e:2x2x1
jax: 0.10.0
libtpu: 0.0.40
codegen_flags: <defaults>
</compile_context>

<pallas_src>
import jax
import jax.numpy as jnp
from jax.experimental import pallas as pl
from jax.experimental.pallas import tpu as pltpu


def _round_up(n, m):
    return (n + m - 1) // m * m


# ---------------------------------------------------------------------------
# Kernel body: fused tanh(x@W1+b1) -> tanh(.@W2+b2) -> .@W3+b3
def _generator_kernel(x_ref, w1_ref, b1_ref, w2_ref, b2_ref, w3_ref, b3_ref, o_ref):
    cdt = w1_ref.dtype  # MXU operand dtype (bf16 default, f32 opt-in)

    x = x_ref[...]

    # Layer 1: MXU matmul, f32 accumulation, f32 bias add, f32 tanh (EUP).
    h = jnp.dot(x, w1_ref[...], preferred_element_type=jnp.float32) + b1_ref[...]
    h = jnp.tanh(h).astype(cdt)  # tanh stays f32 (v5e EUP has no bf16 path)

    # Layer 2
    h = jnp.dot(h, w2_ref[...], preferred_element_type=jnp.float32) + b2_ref[...]
    h = jnp.tanh(h).astype(cdt)

    # Layer 3 (no activation, matches the module)
    out = jnp.dot(h, w3_ref[...], preferred_element_type=jnp.float32) + b3_ref[...]
    o_ref[...] = out.astype(o_ref.dtype)


# ---------------------------------------------------------------------------
# One-time parameter preparation (hoisted out of the per-call path).
def prepare_generator_params(params, compute_dtype=jnp.bfloat16):
    """Pad hidden/output dims to multiples of 128 and cast weights once."""
    w1, b1, w2, b2, w3, b3 = params
    in_dim, hid = w1.shape
    out_dim = w3.shape[1]
    cdt = jnp.dtype(compute_dtype)

    hid_p = max(_round_up(hid, 128), 128)
    out_p = max(_round_up(out_dim, 128), 128)

    def row(b, n_pad):
        b = b.reshape(1, -1)
        return jnp.pad(b, ((0, 0), (0, n_pad - b.shape[1]))).astype(jnp.float32)

    return dict(
        w1=jnp.pad(w1, ((0, 0), (0, hid_p - hid))).astype(cdt),
        b1=row(b1, hid_p),
        w2=jnp.pad(w2, ((0, hid_p - hid), (0, hid_p - hid))).astype(cdt),
        b2=row(b2, hid_p),
        w3=jnp.pad(w3, ((0, hid_p - hid), (0, out_p - out_dim))).astype(cdt),
        b3=row(b3, out_p),
        in_dim=in_dim, hid=hid, hid_p=hid_p, out_dim=out_dim, out_p=out_p,
        compute_dtype=cdt,
    )


# ---------------------------------------------------------------------------
# VMEM budgeting / batch-tile selection.
def _vmem_budget_bytes():
    """Generation-aware scoped-VMEM budget (leave headroom for Mosaic scratch)."""
    try:
        cap = int(pltpu.get_tpu_info().vmem_capacity_bytes)
    except Exception:
        cap = 64 << 20  # conservative (v7x per-TC) if query unavailable
    # ~80% of physical: ~51 MiB on v7x (64 MiB), 100 MiB cap on v5e/v6e (128 MiB)
    return int(min(cap * 8 // 10, 100 << 20))


def _vmem_needed(tb, in_dim, hid_p, out_p, c_sz, o_sz):
    return (
        2 * tb * in_dim * c_sz                                      # x tiles (2 bufs)
        + 2 * tb * out_p * o_sz                                     # out tiles (2 bufs)
        + (in_dim * hid_p + hid_p * hid_p + hid_p * out_p) * c_sz   # weights (1 buf)
        + (2 * hid_p + out_p) * 4                                   # biases (f32)
        + 3 * tb * hid_p * 4                                        # f32 intermediates
    )


def _pick_batch_tile(B, in_dim, hid_p, out_p, c_sz, o_sz, budget, align):
    fits = lambda tb: _vmem_needed(tb, in_dim, hid_p, out_p, c_sz, o_sz) <= budget
    B_al = _round_up(max(B, 1), align)
    # Whole batch in a single grid step whenever it fits: nothing worth
    # pipelining at these tile sizes, and extra steps are pure overhead.
    if B_al <= 1024 and fits(B_al):
        return B_al
    for tb in (1024, 512, 256, 128, 64, 32, 16):
        if tb >= align and tb % align == 0 and fits(tb):
            return tb
    return align


# ---------------------------------------------------------------------------
# Forward pass (expects pre-padded params from prepare_generator_params).
def generator_forward(x, prepared, *, batch_tile=None):
    in_dim = prepared["in_dim"]
    hid_p = prepared["hid_p"]
    out_p = prepared["out_p"]
    out_dim = prepared["out_dim"]
    cdt = prepared["compute_dtype"]

    B = x.shape[0]
    out_dtype = x.dtype
    c_sz = jnp.dtype(cdt).itemsize
    o_sz = jnp.dtype(out_dtype).itemsize

    # bf16 packs two rows per sublane -> 16-row minimum tile keeps layout dense.
    align = 16 if c_sz < 4 else 8
    budget = _vmem_budget_bytes()

    # TODO(synk): add a hidden-dim tiled fallback (grid axis over hid_p blocks
    # with a VMEM accumulator) for generators whose resident weights exceed the
    # VMEM budget (hid ~>= 2900 bf16 on v7x); not needed at these shapes.

    if batch_tile is None:
        tb = _pick_batch_tile(B, in_dim, hid_p, out_p, c_sz, o_sz, budget, align)
    else:
        tb = _round_up(batch_tile, align)
    B_pad = _round_up(B, tb)

    xp = x.astype(cdt)
    if B_pad != B:
        xp = jnp.pad(xp, ((0, B_pad - B), (0, 0)))
    grid = (B_pad // tb,)

    vmem_needed = _vmem_needed(tb, in_dim, hid_p, out_p, c_sz, o_sz)
    vmem_limit = int(min(max(vmem_needed + (4 << 20), 16 << 20), budget))

    # Resident (grid-invariant) operands: constant index_map, single-buffered.
    def resident(shape):
        return pl.BlockSpec(shape, lambda i: (0, 0), pipeline_mode=pl.Buffered(1))

    out_padded = pl.pallas_call(
        _generator_kernel,
        out_shape=jax.ShapeDtypeStruct((B_pad, out_p), out_dtype),
        grid=grid,
        in_specs=[
            pl.BlockSpec((tb, in_dim), lambda i: (i, 0)),   # x tile (pipelined)
            resident((in_dim, hid_p)),                      # W1
            resident((1, hid_p)),                           # b1
            resident((hid_p, hid_p)),                       # W2
            resident((1, hid_p)),                           # b2
            resident((hid_p, out_p)),                       # W3
            resident((1, out_p)),                           # b3
        ],
        out_specs=pl.BlockSpec((tb, out_p), lambda i: (i, 0)),
        compiler_params=pltpu.CompilerParams(
            dimension_semantics=("parallel",),
            vmem_limit_bytes=vmem_limit,
        ),
    )(xp, prepared["w1"], prepared["b1"], prepared["w2"], prepared["b2"],
      prepared["w3"], prepared["b3"])

    # Only pay the slice copy when the shapes actually require it.
    if B_pad != B or out_p != out_dim:
        return out_padded[:B, :out_dim]
    return out_padded


# ---------------------------------------------------------------------------
# PyTorch-style Linear init: U(-1/sqrt(fan_in), 1/sqrt(fan_in)).
def init_generator_params(key, input_size, hidden_size, output_size, dtype=jnp.float32):
    def linear(k, fan_in, fan_out):
        kw, kb = jax.random.split(k)
        bound = 1.0 / jnp.sqrt(fan_in)
        w = jax.random.uniform(kw, (fan_in, fan_out), dtype, -bound, bound)
        b = jax.random.uniform(kb, (1, fan_out), dtype, -bound, bound)
        return w, b

    k1, k2, k3 = jax.random.split(key, 3)
    w1, b1 = linear(k1, input_size, hidden_size)
    w2, b2 = linear(k2, hidden_size, hidden_size)
    w3, b3 = linear(k3, hidden_size, output_size)
    return (w1, b1, w2, b2, w3, b3)


def _reference_forward(x, params):
    w1, b1, w2, b2, w3, b3 = params
    h = jnp.tanh(x @ w1 + b1)
    h = jnp.tanh(h @ w2 + b2)
    return h @ w3 + b3


if __name__ == "__main__":
    # Small shapes consistent with the module: Generator(input, hidden, output).
    batch, input_size, hidden_size, output_size = 256, 8, 32, 8

    key = jax.random.PRNGKey(0)
    k_params, k_x = jax.random.split(key)

    params = init_generator_params(k_params, input_size, hidden_size, output_size)
    x = jax.random.normal(k_x, (batch, input_size), dtype=jnp.float32)

    ref = _reference_forward(x, params)

    # Default fast path: bf16 MXU operands, f32 accumulation/tanh. Params are
    # padded/cast ONCE here and reused across calls (launch-path win).
    prep_bf16 = prepare_generator_params(params)  # compute_dtype=bfloat16
    out_bf16 = jax.block_until_ready(generator_forward(x, prep_bf16))
    assert out_bf16.shape == (batch, output_size)
    assert jnp.allclose(out_bf16, ref, atol=5e-2, rtol=5e-2), "bf16 mismatch vs reference"

    # Opt-in accuracy mode: f32 MXU operands -> tight match with the reference.
    prep_f32 = prepare_generator_params(params, compute_dtype=jnp.float32)
    out_f32 = jax.block_until_ready(generator_forward(x, prep_f32))
    assert out_f32.shape == (batch, output_size)
    assert jnp.allclose(out_f32, ref, atol=1e-5, rtol=1e-5), "f32 mismatch vs reference"

    print("KERNEL_OK")
</pallas_src>

<mosaic_0001>
module attributes {stable_mosaic.version = 11 : i64} {
  func.func @_generator_kernel(%arg0: i32, %arg1: memref<256x8xbf16, #tpu.memory_space<vmem>>, %arg2: memref<8x128xbf16, #tpu.memory_space<vmem>>, %arg3: memref<1x128xf32, #tpu.memory_space<vmem>>, %arg4: memref<128x128xbf16, #tpu.memory_space<vmem>>, %arg5: memref<1x128xf32, #tpu.memory_space<vmem>>, %arg6: memref<128x128xbf16, #tpu.memory_space<vmem>>, %arg7: memref<1x128xf32, #tpu.memory_space<vmem>>, %arg8: memref<256x128xf32, #tpu.memory_space<vmem>>) attributes {dimension_semantics = [#tpu.dimension_semantics<parallel>], iteration_bounds = array<i64: 1>, scalar_prefetch = 0 : i64, scratch_operands = 0 : i64, tpu.core_type = #tpu.core_type<tc>, window_params = [{transform_indices = @transform_0, window_bounds = array<i64: 256, 8>}, {pipeline_mode = #tpu.pipeline_mode<synchronous>, transform_indices = @transform_1, window_bounds = array<i64: 8, 128>}, {pipeline_mode = #tpu.pipeline_mode<synchronous>, transform_indices = @transform_2, window_bounds = array<i64: 1, 128>}, {pipeline_mode = #tpu.pipeline_mode<synchronous>, transform_indices = @transform_3, window_bounds = array<i64: 128, 128>}, {pipeline_mode = #tpu.pipeline_mode<synchronous>, transform_indices = @transform_4, window_bounds = array<i64: 1, 128>}, {pipeline_mode = #tpu.pipeline_mode<synchronous>, transform_indices = @transform_5, window_bounds = array<i64: 128, 128>}, {pipeline_mode = #tpu.pipeline_mode<synchronous>, transform_indices = @transform_6, window_bounds = array<i64: 1, 128>}, {transform_indices = @transform_7, window_bounds = array<i64: 256, 128>}]} {
    %c0 = arith.constant 0 : index
    %c0_0 = arith.constant 0 : index
    %0 = vector.load %arg1[%c0, %c0_0] : memref<256x8xbf16, #tpu.memory_space<vmem>>, vector<256x8xbf16>
    %c0_1 = arith.constant 0 : index
    %c0_2 = arith.constant 0 : index
    %1 = vector.load %arg2[%c0_1, %c0_2] : memref<8x128xbf16, #tpu.memory_space<vmem>>, vector<8x128xbf16>
    %cst = arith.constant dense<0.000000e+00> : vector<256x128xf32>
    %2 = tpu.matmul %0, %1, %cst {dimension_numbers = #tpu.dot_dimension_numbers<[1], [0], [0], [1], [0, 0, 1, 1], [], []>} : vector<256x8xbf16>, vector<8x128xbf16>, vector<256x128xf32> -> vector<256x128xf32>
    %c0_3 = arith.constant 0 : index
    %c0_4 = arith.constant 0 : index
    %3 = vector.load %arg3[%c0_3, %c0_4] : memref<1x128xf32, #tpu.memory_space<vmem>>, vector<1x128xf32>
    %4 = vector.broadcast %3 : vector<1x128xf32> to vector<256x128xf32>
    %5 = arith.addf %2, %4 : vector<256x128xf32>
    %6 = math.tanh %5 : vector<256x128xf32>
    %7 = arith.truncf %6 : vector<256x128xf32> to vector<256x128xbf16>
    %c0_5 = arith.constant 0 : index
    %c0_6 = arith.constant 0 : index
    %8 = vector.load %arg4[%c0_5, %c0_6] : memref<128x128xbf16, #tpu.memory_space<vmem>>, vector<128x128xbf16>
    %cst_7 = arith.constant dense<0.000000e+00> : vector<256x128xf32>
    %9 = tpu.matmul %7, %8, %cst_7 {dimension_numbers = #tpu.dot_dimension_numbers<[1], [0], [0], [1], [0, 0, 1, 1], [], []>} : vector<256x128xbf16>, vector<128x128xbf16>, vector<256x128xf32> -> vector<256x128xf32>
    %c0_8 = arith.constant 0 : index
    %c0_9 = arith.constant 0 : index
    %10 = vector.load %arg5[%c0_8, %c0_9] : memref<1x128xf32, #tpu.memory_space<vmem>>, vector<1x128xf32>
    %11 = vector.broadcast %10 : vector<1x128xf32> to vector<256x128xf32>
    %12 = arith.addf %9, %11 : vector<256x128xf32>
    %13 = math.tanh %12 : vector<256x128xf32>
    %14 = arith.truncf %13 : vector<256x128xf32> to vector<256x128xbf16>
    %c0_10 = arith.constant 0 : index
    %c0_11 = arith.constant 0 : index
    %15 = vector.load %arg6[%c0_10, %c0_11] : memref<128x128xbf16, #tpu.memory_space<vmem>>, vector<128x128xbf16>
    %cst_12 = arith.constant dense<0.000000e+00> : vector<256x128xf32>
    %16 = tpu.matmul %14, %15, %cst_12 {dimension_numbers = #tpu.dot_dimension_numbers<[1], [0], [0], [1], [0, 0, 1, 1], [], []>} : vector<256x128xbf16>, vector<128x128xbf16>, vector<256x128xf32> -> vector<256x128xf32>
    %c0_13 = arith.constant 0 : index
    %c0_14 = arith.constant 0 : index
    %17 = vector.load %arg7[%c0_13, %c0_14] : memref<1x128xf32, #tpu.memory_space<vmem>>, vector<1x128xf32>
    %18 = vector.broadcast %17 : vector<1x128xf32> to vector<256x128xf32>
    %19 = arith.addf %16, %18 : vector<256x128xf32>
    %c0_15 = arith.constant 0 : index
    %c0_16 = arith.constant 0 : index
    %20 = vector.load %arg8[%c0_15, %c0_16] : memref<256x128xf32, #tpu.memory_space<vmem>>, vector<256x128xf32>
    tpu.vector_store %arg8[%c0_15, %c0_16], %19 {strides = array<i32>} : memref<256x128xf32, #tpu.memory_space<vmem>>, vector<256x128xf32>,
    return
  }
  func.func @transform_0(%arg0: i32) -> (i32, i32) {
    %c0_i32 = arith.constant 0 : i32
    %c0_i32_0 = arith.constant 0 : i32
    return %arg0, %c0_i32 : i32, i32
  }
  func.func @transform_1(%arg0: i32) -> (i32, i32) {
    %c0_i32 = arith.constant 0 : i32
    %c0_i32_0 = arith.constant 0 : i32
    %c0_i32_1 = arith.constant 0 : i32
    return %c0_i32, %c0_i32_0 : i32, i32
  }
  func.func @transform_2(%arg0: i32) -> (i32, i32) {
    %c0_i32 = arith.constant 0 : i32
    %c0_i32_0 = arith.constant 0 : i32
    %c0_i32_1 = arith.constant 0 : i32
    return %c0_i32, %c0_i32_0 : i32, i32
  }
  func.func @transform_3(%arg0: i32) -> (i32, i32) {
    %c0_i32 = arith.constant 0 : i32
    %c0_i32_0 = arith.constant 0 : i32
    %c0_i32_1 = arith.constant 0 : i32
    return %c0_i32, %c0_i32_0 : i32, i32
  }
  func.func @transform_4(%arg0: i32) -> (i32, i32) {
    %c0_i32 = arith.constant 0 : i32
    %c0_i32_0 = arith.constant 0 : i32
    %c0_i32_1 = arith.constant 0 : i32
    return %c0_i32, %c0_i32_0 : i32, i32
  }
  func.func @transform_5(%arg0: i32) -> (i32, i32) {
    %c0_i32 = arith.constant 0 : i32
    %c0_i32_0 = arith.constant 0 : i32
    %c0_i32_1 = arith.constant 0 : i32
    return %c0_i32, %c0_i32_0 : i32, i32
  }
  func.func @transform_6(%arg0: i32) -> (i32, i32) {
    %c0_i32 = arith.constant 0 : i32
    %c0_i32_0 = arith.constant 0 : i32
    %c0_i32_1 = arith.constant 0 : i32
    return %c0_i32, %c0_i32_0 : i32, i32
  }
  func.func @transform_7(%arg0: i32) -> (i32, i32) {
    %c0_i32 = arith.constant 0 : i32
    %c0_i32_0 = arith.constant 0 : i32
    return %arg0, %c0_i32 : i32, i32
  }
}

</mosaic_0001>

<bundles_post_ra>
// kernel: tpu_custom_call.1
= control target key start
LH: loop header
LB: loop body
LE: loop exit
PB: predicated region body
PF: predicated region fallthrough
CT: control target
= control target key end

     0   :  { %vm197_vm0 = vcmask 1043456   ;;  %vm148_vm1 = vcmask 64512   ;;  %s1695_s0 = inlined_call_operand.vmem [shape: bf16[256,8], index: 0, kind: input, shape index: {}]   ;;  %s1696_s1 = inlined_call_operand.vmem [shape: bf16[8,128], index: 1, kind: input, shape index: {}]   ;;  %s1697_s2 = inlined_call_operand.vmem [shape: f32[1,128], index: 2, kind: input, shape index: {}]   ;;  %s1698_s3 = inlined_call_operand.vmem [shape: bf16[128,128], index: 3, kind: input, shape index: {}]   ;;  %s1699_s4 = inlined_call_operand.vmem [shape: f32[1,128], index: 4, kind: input, shape index: {}]   ;;  %s1700_s5 = inlined_call_operand.vmem [shape: bf16[128,128], index: 5, kind: input, shape index: {}]   ;;  %s1701_s6 = inlined_call_operand.vmem [shape: f32[1,128], index: 6, kind: input, shape index: {}]   ;;  %s1702_s7 = inlined_call_operand.hbm [shape: f32[256,128], index: 7, kind: output, shape index: {}]  }
   0x1   :  { %v60_v0 = vld [vmem:[%s1696_s1] sm:$0xf]  ;;  %v1224_v3 = vld [vmem:[%s1695_s0 + $0x8] sm:$0xff]   ;;  %v1225_v4 = vld [vmem:[%s1695_s0 + $0x10] sm:$0xff]  }
   0x2   :  { %v1223_v1 = vld [vmem:[%s1695_s0] sm:$0xff]   ;;  %1218 = vmatprep.subr.msk.bf16.mxu0 %vm197_vm0, %v60_v0  ;;  %v199_v2 = vsel %vm197_vm0, %v60_v0, 0  ;;  %1219 = vmatprep.subr.msk.bf16.mxu1 %vm197_vm0, %v60_v0  ;;  %v1226_v5 = vld [vmem:[%s1695_s0 + $0x18] sm:$0xff]   ;;  %v1232_v8 = vld [vmem:[%s1695_s0 + $0x48] sm:$0xff]  }
   0x3   :  { %1087 = vmatpush3.bf16.msra.mxu0 %v199_v2  ;;  %1088 = vmatprep.mubr.msk.bf16.mxu0 %vm148_vm1, %v1223_v1  ;;  %v1227_v6 = vld [vmem:[%s1695_s0 + $0x20] sm:$0xff]   ;;  %v1233_v9 = vld [vmem:[%s1695_s0 + $0x50] sm:$0xff]   ;;  %v1228_v10 = vld [vmem:[%s1695_s0 + $0x28] sm:$0xff]  }
   0x4   :  { %1217 = vmatpush3.bf16.msra.mxu1 %v199_v2  ;;  %v1231_v7 = vld [vmem:[%s1695_s0 + $0x40] sm:$0xff]   ;;  %v1234_v11 = vld [vmem:[%s1695_s0 + $0x58] sm:$0xff]   ;;  %v1229_v12 = vld [vmem:[%s1695_s0 + $0x30] sm:$0xff]  }
   0x5   :  { %1104 = vmatprep.mubr.msk.bf16.mxu1 %vm148_vm1, %v1231_v7  ;;  %v1235_v13 = vld [vmem:[%s1695_s0 + $0x60] sm:$0xff]   ;;  %v1239_v14 = vld [vmem:[%s1698_s3 + $0x38] sm:$0xff]   ;;  %v1240_v15 = vld [vmem:[%s1698_s3 + $0x30] sm:$0xff]  }
   0x6   :  { %1089 = vmatmul.mubr.msk.bf16.vlgmr.msra.gmra.mxu0 %vm148_vm1, %v1224_v3  ;;  %1120 = vmatprep.subr.bf16.mxu1 %v1239_v14  ;;  %v1236_v16 = vld [vmem:[%s1695_s0 + $0x68] sm:$0xff]   ;;  %v1230_v17 = vld [vmem:[%s1695_s0 + $0x38] sm:$0xff]   ;;  %v1237_v18 = vld [vmem:[%s1695_s0 + $0x70] sm:$0xff]  }
   0x7   :  { %1092 = vmatprep.mubr.msk.bf16.mxu0 %vm148_vm1, %v1225_v4  ;;  %1105 = vmatmul.mubr.msk.bf16.vlgmr.msra.gmra.mxu1 %vm148_vm1, %v1232_v8 }
   0x8   :  { %1108 = vmatprep.mubr.msk.bf16.mxu1 %vm148_vm1, %v1233_v9  ;;  %1121 = vmatpush3.bf16.msra.mxu1 %v1239_v14 }
   0x9   :  { %1122 = vmatprep.subr.bf16.mxu1 %v1240_v15 }
   0xc   :  { %1123 = vmatpush3.bf16.msra.mxu1 %v1240_v15 }
   0xe   :  { %1093 = vmatmul.mubr.msk.bf16.gmra.mxu0 %vm148_vm1, %v1226_v5 }
   0xf   :  { %1096 = vmatprep.mubr.msk.bf16.mxu0 %vm148_vm1, %v1227_v6  ;;  %1109 = vmatmul.mubr.msk.bf16.gmra.mxu1 %vm148_vm1, %v1234_v11 }
  0x10   :  { %1112 = vmatprep.mubr.msk.bf16.mxu1 %vm148_vm1, %v1235_v13 }
  0x16   :  { %1097 = vmatmul.mubr.msk.bf16.gmra.mxu0 %vm148_vm1, %v1228_v10 }
  0x17   :  { %1100 = vmatprep.mubr.msk.bf16.mxu0 %vm148_vm1, %v1229_v12  ;;  %1113 = vmatmul.mubr.msk.bf16.gmra.mxu1 %vm148_vm1, %v1236_v16 }
  0x18   :  { %12 = vsyncpa [#allocation3], 0  ;;  %1116 = vmatprep.mubr.msk.bf16.mxu1 %vm148_vm1, %v1237_v18  ;;  %v1238_v19 = vld [vmem:[%s1695_s0 + $0x78] sm:$0xff]   ;;  %v1241_v20 = vld [vmem:[%s1698_s3 + $0x28] sm:$0xff]  }
  0x19   :  { %1124 = vmatprep.subr.bf16.mxu1 %v1241_v20  ;;  %v1242_v21 = vld [vmem:[%s1698_s3 + $0x20] sm:$0xff]   ;;  %v1243_v22 = vld [vmem:[%s1698_s3 + $0x18] sm:$0xff]   ;;  %v1244_v23 = vld [vmem:[%s1698_s3 + $0x10] sm:$0xff]  }
  0x1a   :  { %1125 = vmatpush3.bf16.msra.mxu1 %v1241_v20  ;;  %v1245_v24 = vld [vmem:[%s1698_s3 + $0x8] sm:$0xff]   ;;  %v1246_v25 = vld [vmem:[%s1698_s3] sm:$0xff]   ;;  %v1247_v26 = vld [vmem:[%s1700_s5 + $0x38] sm:$0xff]  }
  0x1b   :  { %1126 = vmatprep.subr.bf16.mxu1 %v1242_v21  ;;  %v1248_v27 = vld [vmem:[%s1700_s5 + $0x30] sm:$0xff]   ;;  %1168 = vmatprep.subr.bf16.mxu0 %v1247_v26  ;;  %v1548_v29 = vld [vmem:[%s1697_s2] ss:$0 sm:$0xff] }
  0x1c   :  { %1169 = vmatpush3.bf16.msra.mxu0 %v1247_v26 }
  0x1d   :  { %1170 = vmatprep.subr.bf16.mxu0 %v1248_v27 }
  0x1e   :  { %1101 = vmatmul.mubr.msk.bf16.gmra.mxu0 %vm148_vm1, %v1230_v17  ;;  %1127 = vmatpush3.bf16.msra.mxu1 %v1242_v21 }
  0x1f   :  { %1117 = vmatmul.mubr.msk.bf16.gmra.mxu1 %vm148_vm1, %v1238_v19  ;;  %1128 = vmatprep.subr.bf16.mxu1 %v1243_v22 }
  0x20   :  { %1171 = vmatpush3.bf16.msra.mxu0 %v1248_v27 }
  0x22   :  { %1129 = vmatpush3.bf16.msra.mxu1 %v1243_v22 }
  0x23   :  { %1130 = vmatprep.subr.bf16.mxu1 %v1244_v23 }
  0x26   :  { %1131 = vmatpush3.bf16.msra.mxu1 %v1244_v23 }
  0x27   :  { %1132 = vmatprep.subr.bf16.mxu1 %v1245_v24 }
  0x2a   :  { %1133 = vmatpush3.bf16.msra.mxu1 %v1245_v24 }
  0x2b   :  { %1134 = vmatprep.subr.bf16.mxu1 %v1246_v25 }
  0x2e   :  { %1135 = vmatpush3.bf16.msra.mxu1 %v1246_v25 }
  0xc6   :  { %v1090_v28 = vpop.f32.mrf.mxu0 }
  0xc7   :  { %v244_v34 = vadd.f32 %v1090_v28, %v1548_v29  ;;  %v1554_v37 = vpop.f32.mrf.mxu1 }
  0xc8   :  { %v235_v30 = vpop.f32.mrf.mxu0  ;;  %v308_v23 = vadd.f32 %v1554_v37, %v1548_v29 }
  0xc9   :  { %v236_v31 = vadd.f32 %v1548_v29, %v235_v30  ;;  %v299_v39 = vpop.f32.mrf.mxu1 }
  0xca   :  { %v1091_v32 = vpop.f32.mrf.mxu0  ;;  %v300_v5 = vadd.f32 %v1548_v29, %v299_v39 }
  0xcb   :  { %v247_v33 = vadd.f32 %v1091_v32, %v1548_v29  ;;  %1255 = vtanh.f32 %v236_v31  ;;  %v1557_v42 = vpop.f32.mrf.mxu1 }
  0xcc   :  { %v238_v35 = vpop.f32.mrf.mxu0  ;;  %v311_v27 = vadd.f32 %v1557_v42, %v1548_v29 }
  0xcd   :  { %v239_v36 = vadd.f32 %v1548_v29, %v238_v35  ;;  %1257 = vtanh.f32 %v247_v33  ;;  %v302_v45 = vpop.f32.mrf.mxu1 }
  0xce   :  { %v1094_v38 = vpop.f32.mrf.mxu0  ;;  %v303_v8 = vadd.f32 %v1548_v29, %v302_v45 }
  0xcf   :  { %1259 = vtanh.f32 %v239_v36  ;;  %v260_v46 = vadd.f32 %v1094_v38, %v1548_v29  ;;  %v1562_v49 = vpop.f32.mrf.mxu1 }
  0xd0   :  { %1261 = vtanh.f32 %v244_v34  ;;  %v251_v40 = vpop.f32.mrf.mxu0  ;;  %v324_v36 = vadd.f32 %v1562_v49, %v1548_v29 }
  0xd1   :  { %v252_v41 = vadd.f32 %v1548_v29, %v251_v40  ;;  %v315_v51 = vpop.f32.mrf.mxu1 }
  0xd2   :  { %v1095_v43 = vpop.f32.mrf.mxu0  ;;  %v316_v24 = vadd.f32 %v1548_v29, %v315_v51 }
  0xd3   :  { %v263_v44 = vadd.f32 %v1095_v43, %v1548_v29  ;;  %1263 = vtanh.f32 %v252_v41  ;;  %v1565_v54 = vpop.f32.mrf.mxu1 }
  0xd4   :  { %v254_v47 = vpop.f32.mrf.mxu0  ;;  %v327_v42 = vadd.f32 %v1565_v54, %v1548_v29 }
  0xd5   :  { %v255_v48 = vadd.f32 %v1548_v29, %v254_v47  ;;  %1265 = vtanh.f32 %v263_v44  ;;  %v318_v59 = vpop.f32.mrf.mxu1 }
  0xd6   :  { %v1098_v50 = vpop.f32.mrf.mxu0  ;;  %v319_v25 = vadd.f32 %v1548_v29, %v318_v59 }
  0xd7   :  { %1267 = vtanh.f32 %v255_v48  ;;  %v276_v61 = vadd.f32 %v1098_v50, %v1548_v29  ;;  %v1570_v2 = vpop.f32.mrf.mxu1 }
  0xd8   :  { %1269 = vtanh.f32 %v260_v46  ;;  %v267_v52 = vpop.f32.mrf.mxu0  ;;  %v1256_v55 = vpop.eup %1255  ;;  %v340_v51 = vadd.f32 %v1570_v2, %v1548_v29 }
  0xd9   :  { %v268_v53 = vadd.f32 %v1548_v29, %v267_v52  ;;  %v331_v6 = vpop.f32.mrf.mxu1 }
  0xda   :  { %v1099_v56 = vpop.f32.mrf.mxu0  ;;  %v1258_v57 = vpop.eup %1257  ;;  %v332_v38 = vadd.f32 %v1548_v29, %v331_v6 }
  0xdb   :  { %v279_v58 = vadd.f32 %v1099_v56, %v1548_v29  ;;  %1271 = vtanh.f32 %v268_v53  ;;  %v1575_v12 = vpop.f32.mrf.mxu1 }
  0xdc   :  { %v1260_v60 = vpop.eup %1259  ;;  %v270_v62 = vpop.f32.mrf.mxu0 }
  0xdd   :  { %v1262_v63 = vpop.eup %1261  ;;  %v271_v0 = vadd.f32 %v1548_v29, %v270_v62  ;;  %v394_v1 = vpack.c.bf16 %v1260_v60, %v1256_v55  ;;  %1273 = vtanh.f32 %v279_v58  ;;  %v334_v22 = vpop.f32.mrf.mxu1 }
  0xde   :  { %v1102_v3 = vpop.f32.mrf.mxu0  ;;  %v395_v4 = vpack.c.bf16 %v1258_v57, %v1262_v63  ;;  %v335_v40 = vadd.f32 %v1548_v29, %v334_v22  ;;  %v343_v57 = vadd.f32 %v1575_v12, %v1548_v29 }
  0xdf   :  { %1275 = vtanh.f32 %v271_v0  ;;  %1136 = vmatprep.mubr.bf16.mxu1 %v394_v1  ;;  %v292_v16 = vadd.f32 %v1102_v3, %v1548_v29  ;;  %v1118_v28 = vpop.f32.mrf.mxu1 }
  0xe0   :  { %1277 = vtanh.f32 %v276_v61  ;;  %v283_v7 = vpop.f32.mrf.mxu0  ;;  %1137 = vmatmul.mubr.bf16.vlgmr.msra.gmra.mxu1 %v395_v4  ;;  %v1264_v10 = vpop.eup %1263  ;;  %v356_v63 = vadd.f32 %v1118_v28, %v1548_v29 }
  0xe1   :  { %v284_v9 = vadd.f32 %v1548_v29, %v283_v7  ;;  %1279 = vtanh.f32 %v300_v5  ;;  %v347_v35 = vpop.f32.mrf.mxu1 }
  0xe2   :  { %v1103_v11 = vpop.f32.mrf.mxu0  ;;  %v1266_v13 = vpop.eup %1265  ;;  %1281 = vtanh.f32 %v303_v8  ;;  %v348_v53 = vadd.f32 %v1548_v29, %v347_v35 }
  0xe3   :  { %v295_v14 = vadd.f32 %v1103_v11, %v1548_v29  ;;  %1283 = vtanh.f32 %v284_v9  ;;  %v1119_v43 = vpop.f32.mrf.mxu1 }
  0xe4   :  { %v1268_v15 = vpop.eup %1267  ;;  %v286_v17 = vpop.f32.mrf.mxu0  ;;  %v359_v1 = vadd.f32 %v1119_v43, %v1548_v29 }
  0xe5   :  { %v1270_v18 = vpop.eup %1269  ;;  %v287_v19 = vadd.f32 %v1548_v29, %v286_v17  ;;  %v396_v20 = vpack.c.bf16 %v1268_v15, %v1264_v10  ;;  %1285 = vtanh.f32 %v295_v14  ;;  %v350_v50 = vpop.f32.mrf.mxu1  ;;  %v1250_v14 = vld [vmem:[%s1700_s5 + $0x20] sm:$0xff]   ;;  %v1251_v15 = vld [vmem:[%s1700_s5 + $0x18] sm:$0xff]   ;;  %v1253_v17 = vld [vmem:[%s1700_s5 + $0x8] sm:$0xff]  }
  0xe6   :  { %v397_v21 = vpack.c.bf16 %v1266_v13, %v1270_v18  ;;  %v351_v55 = vadd.f32 %v1548_v29, %v350_v50  ;;  %v1249_v29 = vld [vmem:[%s1700_s5 + $0x28] sm:$0xff]   ;;  %v1254_v18 = vld [vmem:[%s1700_s5] sm:$0xff]  }
  0xe7   :  { %1287 = vtanh.f32 %v287_v19  ;;  %1140 = vmatprep.mubr.bf16.mxu1 %v396_v20  ;;  %1172 = vmatprep.subr.bf16.mxu0 %v1249_v29  ;;  %v1621_v20 = vld [vmem:[%s1699_s4] ss:$0 sm:$0xff] }
  0xe8   :  { %1289 = vtanh.f32 %v292_v16  ;;  %1141 = vmatmul.mubr.bf16.gmra.mxu1 %v397_v21  ;;  %v1272_v26 = vpop.eup %1271  ;;  %1173 = vmatpush3.bf16.msra.mxu0 %v1249_v29  ;;  %v1252_v16 = vld [vmem:[%s1700_s5 + $0x10] sm:$0xff]  }
  0xe9   :  { %1291 = vtanh.f32 %v308_v23  ;;  %1174 = vmatprep.subr.bf16.mxu0 %v1250_v14 }
  0xea   :  { %v1274_v30 = vpop.eup %1273  ;;  %1293 = vtanh.f32 %v316_v24 }
  0xeb   :  { %1295 = vtanh.f32 %v319_v25 }
  0xec   :  { %v1276_v31 = vpop.eup %1275  ;;  %1297 = vtanh.f32 %v311_v27  ;;  %1175 = vmatpush3.bf16.msra.mxu0 %v1250_v14 }
  0xed   :  { %v1278_v32 = vpop.eup %1277  ;;  %v398_v33 = vpack.c.bf16 %v1276_v31, %v1272_v26  ;;  %1299 = vtanh.f32 %v324_v36  ;;  %1176 = vmatprep.subr.bf16.mxu0 %v1251_v15 }
  0xee   :  { %v399_v34 = vpack.c.bf16 %v1274_v30, %v1278_v32  ;;  %v1280_v37 = vpop.eup %1279  ;;  %1301 = vtanh.f32 %v332_v38 }
  0xef   :  { %1144 = vmatprep.mubr.bf16.mxu1 %v398_v33  ;;  %v1282_v39 = vpop.eup %1281  ;;  %1303 = vtanh.f32 %v335_v40 }
  0xf0   :  { %1145 = vmatmul.mubr.bf16.gmra.mxu1 %v399_v34  ;;  %v1284_v41 = vpop.eup %1283  ;;  %v402_v48 = vpack.c.bf16 %v1282_v39, %v1280_v37  ;;  %1305 = vtanh.f32 %v327_v42  ;;  %1177 = vmatpush3.bf16.msra.mxu0 %v1251_v15 }
  0xf1   :  { %1307 = vtanh.f32 %v340_v51  ;;  %1178 = vmatprep.subr.bf16.mxu0 %v1252_v16 }
  0xf2   :  { %v1286_v44 = vpop.eup %1285  ;;  %1309 = vtanh.f32 %v348_v53 }
  0xf3   :  { %1311 = vtanh.f32 %v351_v55 }
  0xf4   :  { %v1288_v45 = vpop.eup %1287  ;;  %1313 = vtanh.f32 %v343_v57  ;;  %1179 = vmatpush3.bf16.msra.mxu0 %v1252_v16 }
  0xf5   :  { %v1290_v46 = vpop.eup %1289  ;;  %v400_v47 = vpack.c.bf16 %v1288_v45, %v1284_v41  ;;  %1315 = vtanh.f32 %v356_v63  ;;  %1180 = vmatprep.subr.bf16.mxu0 %v1253_v17 }
  0xf6   :  { %v401_v49 = vpack.c.bf16 %v1286_v44, %v1290_v46  ;;  %v1292_v52 = vpop.eup %1291  ;;  %1317 = vtanh.f32 %v359_v1 }
  0xf7   :  { %1148 = vmatprep.mubr.bf16.mxu1 %v400_v47  ;;  %v1294_v54 = vpop.eup %1293 }
  0xf8   :  { %1149 = vmatmul.mubr.bf16.gmra.mxu1 %v401_v49  ;;  %v1296_v56 = vpop.eup %1295  ;;  %1181 = vmatpush3.bf16.msra.mxu0 %v1253_v17 }
  0xf9   :  { %1152 = vmatprep.mubr.bf16.mxu1 %v402_v48  ;;  %v1298_v58 = vpop.eup %1297  ;;  %v404_v59 = vpack.c.bf16 %v1296_v56, %v1294_v54  ;;  %1182 = vmatprep.subr.bf16.mxu0 %v1254_v18 }
  0xfa   :  { %v403_v60 = vpack.c.bf16 %v1298_v58, %v1292_v52  ;;  %v1300_v61 = vpop.eup %1299 }
  0xfb   :  { %v1302_v62 = vpop.eup %1301 }
  0xfc   :  { %v1304_v0 = vpop.eup %1303  ;;  %1183 = vmatpush3.bf16.msra.mxu0 %v1254_v18 }
  0xfd   :  { %v1306_v2 = vpop.eup %1305  ;;  %v406_v3 = vpack.c.bf16 %v1304_v0, %v1302_v62 }
  0xfe   :  { %v405_v4 = vpack.c.bf16 %v1306_v2, %v1300_v61  ;;  %v1308_v5 = vpop.eup %1307 }
  0xff   :  { %v1310_v6 = vpop.eup %1309 }
 0x100   :  { %1153 = vmatmul.mubr.bf16.gmra.mxu1 %v403_v60  ;;  %v1312_v7 = vpop.eup %1311 }
 0x101   :  { %1156 = vmatprep.mubr.bf16.mxu1 %v404_v59  ;;  %v1314_v8 = vpop.eup %1313  ;;  %v408_v9 = vpack.c.bf16 %v1312_v7, %v1310_v6 }
 0x102   :  { %v407_v10 = vpack.c.bf16 %v1314_v8, %v1308_v5  ;;  %v1316_v11 = vpop.eup %1315 }
 0x103   :  { %v1318_v12 = vpop.eup %1317 }
 0x104   :  { %v409_v13 = vpack.c.bf16 %v1318_v12, %v1316_v11 }
 0x108   :  { %1157 = vmatmul.mubr.bf16.gmra.mxu1 %v405_v4 }
 0x109   :  { %1160 = vmatprep.mubr.bf16.mxu1 %v406_v3 }
 0x110   :  { %1161 = vmatmul.mubr.bf16.gmra.mxu1 %v407_v10 }
 0x111   :  { %1164 = vmatprep.mubr.bf16.mxu1 %v408_v9 }
 0x118   :  { %1165 = vmatmul.mubr.bf16.gmra.mxu1 %v409_v13 }
 0x1a0   :  { %v1138_v19 = vpop.f32.mrf.mxu1 }
 0x1a1   :  { %v524_v25 = vadd.f32 %v1138_v19, %v1621_v20 }
 0x1a2   :  { %v515_v21 = vpop.f32.mrf.mxu1 }
 0x1a3   :  { %v516_v22 = vadd.f32 %v1621_v20, %v515_v21 }
 0x1a4   :  { %v1139_v23 = vpop.f32.mrf.mxu1 }
 0x1a5   :  { %v527_v24 = vadd.f32 %v1139_v23, %v1621_v20  ;;  %1319 = vtanh.f32 %v516_v22 }
 0x1a6   :  { %v518_v26 = vpop.f32.mrf.mxu1 }
 0x1a7   :  { %v519_v27 = vadd.f32 %v1621_v20, %v518_v26  ;;  %1321 = vtanh.f32 %v527_v24 }
 0x1a8   :  { %v1142_v28 = vpop.f32.mrf.mxu1 }
 0x1a9   :  { %1323 = vtanh.f32 %v519_v27  ;;  %v540_v34 = vadd.f32 %v1142_v28, %v1621_v20 }
 0x1aa   :  { %1325 = vtanh.f32 %v524_v25  ;;  %v531_v30 = vpop.f32.mrf.mxu1 }
 0x1ab   :  { %v532_v31 = vadd.f32 %v1621_v20, %v531_v30 }
 0x1ac   :  { %v1143_v32 = vpop.f32.mrf.mxu1 }
 0x1ad   :  { %v543_v33 = vadd.f32 %v1143_v32, %v1621_v20  ;;  %1327 = vtanh.f32 %v532_v31 }
 0x1ae   :  { %v534_v35 = vpop.f32.mrf.mxu1 }
 0x1af   :  { %v535_v36 = vadd.f32 %v1621_v20, %v534_v35  ;;  %1329 = vtanh.f32 %v543_v33 }
 0x1b0   :  { %v1146_v37 = vpop.f32.mrf.mxu1 }
 0x1b1   :  { %1331 = vtanh.f32 %v535_v36  ;;  %v556_v45 = vadd.f32 %v1146_v37, %v1621_v20 }
 0x1b2   :  { %1333 = vtanh.f32 %v540_v34  ;;  %v547_v38 = vpop.f32.mrf.mxu1  ;;  %v1320_v40 = vpop.eup %1319 }
 0x1b3   :  { %v548_v39 = vadd.f32 %v1621_v20, %v547_v38 }
 0x1b4   :  { %v1147_v41 = vpop.f32.mrf.mxu1  ;;  %v1322_v42 = vpop.eup %1321 }
 0x1b5   :  { %v559_v43 = vadd.f32 %v1147_v41, %v1621_v20  ;;  %1335 = vtanh.f32 %v548_v39 }
 0x1b6   :  { %v1324_v44 = vpop.eup %1323  ;;  %v550_v46 = vpop.f32.mrf.mxu1 }
 0x1b7   :  { %v1326_v47 = vpop.eup %1325  ;;  %v551_v48 = vadd.f32 %v1621_v20, %v550_v46  ;;  %v674_v49 = vpack.c.bf16 %v1324_v44, %v1320_v40  ;;  %1337 = vtanh.f32 %v559_v43 }
 0x1b8   :  { %v1150_v50 = vpop.f32.mrf.mxu1  ;;  %v675_v51 = vpack.c.bf16 %v1322_v42, %v1326_v47 }
 0x1b9   :  { %1339 = vtanh.f32 %v551_v48  ;;  %1184 = vmatprep.mubr.bf16.mxu0 %v674_v49  ;;  %v572_v59 = vadd.f32 %v1150_v50, %v1621_v20 }
 0x1ba   :  { %1341 = vtanh.f32 %v556_v45  ;;  %v563_v52 = vpop.f32.mrf.mxu1  ;;  %1185 = vmatmul.mubr.bf16.vlgmr.msra.gmra.mxu0 %v675_v51  ;;  %v1328_v54 = vpop.eup %1327 }
 0x1bb   :  { %v564_v53 = vadd.f32 %v1621_v20, %v563_v52 }
 0x1bc   :  { %v1151_v55 = vpop.f32.mrf.mxu1  ;;  %v1330_v56 = vpop.eup %1329 }
 0x1bd   :  { %v575_v57 = vadd.f32 %v1151_v55, %v1621_v20  ;;  %1343 = vtanh.f32 %v564_v53 }
 0x1be   :  { %v1332_v58 = vpop.eup %1331  ;;  %v566_v60 = vpop.f32.mrf.mxu1 }
 0x1bf   :  { %v1334_v61 = vpop.eup %1333  ;;  %v567_v62 = vadd.f32 %v1621_v20, %v566_v60  ;;  %v676_v63 = vpack.c.bf16 %v1332_v58, %v1328_v54  ;;  %1345 = vtanh.f32 %v575_v57 }
 0x1c0   :  { %v1154_v0 = vpop.f32.mrf.mxu1  ;;  %v677_v1 = vpack.c.bf16 %v1330_v56, %v1334_v61 }
 0x1c1   :  { %1347 = vtanh.f32 %v567_v62  ;;  %1188 = vmatprep.mubr.bf16.mxu0 %v676_v63  ;;  %v588_v9 = vadd.f32 %v1154_v0, %v1621_v20 }
 0x1c2   :  { %1349 = vtanh.f32 %v572_v59  ;;  %v579_v2 = vpop.f32.mrf.mxu1  ;;  %1189 = vmatmul.mubr.bf16.gmra.mxu0 %v677_v1  ;;  %v1336_v4 = vpop.eup %1335 }
 0x1c3   :  { %v580_v3 = vadd.f32 %v1621_v20, %v579_v2 }
 0x1c4   :  { %v1155_v5 = vpop.f32.mrf.mxu1  ;;  %v1338_v6 = vpop.eup %1337 }
 0x1c5   :  { %v591_v7 = vadd.f32 %v1155_v5, %v1621_v20  ;;  %1351 = vtanh.f32 %v580_v3  ;;  %v1658_v5 = vld [vmem:[%s1701_s6] ss:$0 sm:$0xff]  ;;  %s1405_s6 = smov [#allocation2]  }
 0x1c6   :  { %v1340_v8 = vpop.eup %1339  ;;  %v582_v10 = vpop.f32.mrf.mxu1  ;;  %s959_s19 = sshll.u32 %s1405_s6, 4  ;;  %s960_s19 = int_to_ptr.vmem [resolvable:$true] %s959_s19 }
 0x1c7   :  { %v1342_v11 = vpop.eup %1341  ;;  %v583_v12 = vadd.f32 %v1621_v20, %v582_v10  ;;  %v678_v13 = vpack.c.bf16 %v1340_v8, %v1336_v4  ;;  %1353 = vtanh.f32 %v591_v7  ;;  %s1383_s0 = scalar_lea.vmem %s960_s19, 4096  ;;  %p1388_p1 = scmp.lt.s32.totalorder %s960_s19, %s960_s19 }
 0x1c8   :  { %v1158_v29 = vpop.f32.mrf.mxu1  ;;  %v679_v14 = vpack.c.bf16 %v1338_v6, %v1342_v11  ;;  %p1384_p0 = scmp.ne.s32.totalorder %s960_s19, %s1383_s0  ;;  %p1389_p2 = scmp.lt.s32.totalorder %s1383_s0, %s1383_s0 }
 0x1c9   :  { %1355 = vtanh.f32 %v583_v12  ;;  %1192 = vmatprep.mubr.bf16.mxu0 %v678_v13  ;;  %v604_v23 = vadd.f32 %v1158_v29, %v1621_v20 }
 0x1ca   :  { %1357 = vtanh.f32 %v588_v9  ;;  %v595_v15 = vpop.f32.mrf.mxu1  ;;  %1193 = vmatmul.mubr.bf16.gmra.mxu0 %v679_v14  ;;  %v1344_v17 = vpop.eup %1343  ;;  %p1390_p3 = por %p1389_p2, %p1388_p1 }
 0x1cb   :  { %v596_v16 = vadd.f32 %v1621_v20, %v595_v15 }
 0x1cc   :  { %v1159_v18 = vpop.f32.mrf.mxu1  ;;  %v1346_v19 = vpop.eup %1345  ;;  %p1391_p4 = pnand %p1390_p3, %p1384_p0 }
 0x1cd   :  { %v607_v21 = vadd.f32 %v1159_v18, %v1621_v20  ;;  %1359 = vtanh.f32 %v596_v16 }
 0x1ce   :  { %v1348_v22 = vpop.eup %1347  ;;  %v598_v24 = vpop.f32.mrf.mxu1 }
 0x1cf   :  { %v1350_v25 = vpop.eup %1349  ;;  %v599_v26 = vadd.f32 %v1621_v20, %v598_v24  ;;  %v680_v27 = vpack.c.bf16 %v1348_v22, %v1344_v17  ;;  %1361 = vtanh.f32 %v607_v21 }
 0x1d0   :  { %v1162_v28 = vpop.f32.mrf.mxu1  ;;  %v681_v30 = vpack.c.bf16 %v1346_v19, %v1350_v25 }
 0x1d1   :  { %1363 = vtanh.f32 %v599_v26  ;;  %1196 = vmatprep.mubr.bf16.mxu0 %v680_v27  ;;  %v620_v38 = vadd.f32 %v1162_v28, %v1621_v20 }
 0x1d2   :  { %1365 = vtanh.f32 %v604_v23  ;;  %v611_v31 = vpop.f32.mrf.mxu1  ;;  %1197 = vmatmul.mubr.bf16.gmra.mxu0 %v681_v30  ;;  %v1352_v33 = vpop.eup %1351 }
 0x1d3   :  { %v612_v32 = vadd.f32 %v1621_v20, %v611_v31 }
 0x1d4   :  { %v1163_v34 = vpop.f32.mrf.mxu1  ;;  %v1354_v35 = vpop.eup %1353 }
 0x1d5   :  { %v623_v36 = vadd.f32 %v1163_v34, %v1621_v20  ;;  %1367 = vtanh.f32 %v612_v32 }
 0x1d6   :  { %v1356_v37 = vpop.eup %1355  ;;  %v614_v39 = vpop.f32.mrf.mxu1 }
 0x1d7   :  { %v1358_v40 = vpop.eup %1357  ;;  %v615_v41 = vadd.f32 %v1621_v20, %v614_v39  ;;  %v682_v42 = vpack.c.bf16 %v1356_v37, %v1352_v33  ;;  %1369 = vtanh.f32 %v623_v36 }
 0x1d8   :  { %v1166_v43 = vpop.f32.mrf.mxu1  ;;  %v683_v44 = vpack.c.bf16 %v1354_v35, %v1358_v40 }
 0x1d9   :  { %1371 = vtanh.f32 %v615_v41  ;;  %1200 = vmatprep.mubr.bf16.mxu0 %v682_v42  ;;  %v636_v52 = vadd.f32 %v1166_v43, %v1621_v20 }
 0x1da   :  { %1373 = vtanh.f32 %v620_v38  ;;  %v627_v45 = vpop.f32.mrf.mxu1  ;;  %1201 = vmatmul.mubr.bf16.gmra.mxu0 %v683_v44  ;;  %v1360_v47 = vpop.eup %1359 }
 0x1db   :  { %v628_v46 = vadd.f32 %v1621_v20, %v627_v45 }
 0x1dc   :  { %v1167_v48 = vpop.f32.mrf.mxu1  ;;  %v1362_v49 = vpop.eup %1361 }
 0x1dd   :  { %v639_v50 = vadd.f32 %v1167_v48, %v1621_v20  ;;  %1375 = vtanh.f32 %v628_v46 }
 0x1de   :  { %v1364_v51 = vpop.eup %1363  ;;  %v630_v53 = vpop.f32.mrf.mxu1 }
 0x1df   :  { %v1366_v54 = vpop.eup %1365  ;;  %v631_v55 = vadd.f32 %v1621_v20, %v630_v53  ;;  %v684_v56 = vpack.c.bf16 %v1364_v51, %v1360_v47  ;;  %1377 = vtanh.f32 %v639_v50 }
 0x1e0   :  { %v685_v57 = vpack.c.bf16 %v1362_v49, %v1366_v54 }
 0x1e1   :  { %1379 = vtanh.f32 %v631_v55  ;;  %1204 = vmatprep.mubr.bf16.mxu0 %v684_v56 }
 0x1e2   :  { %1381 = vtanh.f32 %v636_v52  ;;  %1205 = vmatmul.mubr.bf16.gmra.mxu0 %v685_v57  ;;  %v1368_v58 = vpop.eup %1367 }
 0x1e4   :  { %v1370_v59 = vpop.eup %1369 }
 0x1e6   :  { %v1372_v60 = vpop.eup %1371 }
 0x1e7   :  { %v1374_v61 = vpop.eup %1373  ;;  %v686_v62 = vpack.c.bf16 %v1372_v60, %v1368_v58 }
 0x1e8   :  { %v687_v63 = vpack.c.bf16 %v1370_v59, %v1374_v61 }
 0x1e9   :  { %1208 = vmatprep.mubr.bf16.mxu0 %v686_v62 }
 0x1ea   :  { %1209 = vmatmul.mubr.bf16.gmra.mxu0 %v687_v63  ;;  %v1376_v0 = vpop.eup %1375 }
 0x1ec   :  { %v1378_v1 = vpop.eup %1377 }
 0x1ee   :  { %v1380_v2 = vpop.eup %1379 }
 0x1ef   :  { %v1382_v3 = vpop.eup %1381  ;;  %v688_v20 = vpack.c.bf16 %v1380_v2, %v1376_v0 }
 0x1f0   :  { %v689_v4 = vpack.c.bf16 %v1378_v1, %v1382_v3 }
 0x1f1   :  { %1212 = vmatprep.mubr.bf16.mxu0 %v688_v20 }
 0x1f2   :  { %1213 = vmatmul.mubr.bf16.gmra.mxu0 %v689_v4 }
 0x27a   :  { %v1186_v6 = vpop.f32.mrf.mxu0 }
 0x27b   :  { %v804_v7 = vadd.f32 %v1186_v6, %v1658_v5 }
 0x27c   :  { %v795_v8 = vpop.f32.mrf.mxu0 }
 0x27d   :  { %924 = vst [vmem:[#allocation2 + $0x10] sm:$0xff] %v804_v7  ;;  %v796_v9 = vadd.f32 %v1658_v5, %v795_v8 }
 0x27e   :  { %v1187_v10 = vpop.f32.mrf.mxu0 }
 0x27f   :  { %922 = vst [vmem:[#allocation2] sm:$0xff] %v796_v9  ;;  %v807_v11 = vadd.f32 %v1187_v10, %v1658_v5 }
 0x280   :  { %v798_v12 = vpop.f32.mrf.mxu0 }
 0x281   :  { %925 = vst [vmem:[#allocation2 + $0x18] sm:$0xff] %v807_v11  ;;  %v799_v13 = vadd.f32 %v1658_v5, %v798_v12 }
 0x282   :  { %v1190_v29 = vpop.f32.mrf.mxu0 }
 0x283   :  { %923 = vst [vmem:[#allocation2 + $0x8] sm:$0xff] %v799_v13  ;;  %v820_v14 = vadd.f32 %v1190_v29, %v1658_v5 }
 0x284   :  { %v811_v15 = vpop.f32.mrf.mxu0 }
 0x285   :  { %928 = vst [vmem:[#allocation2 + $0x30] sm:$0xff] %v820_v14  ;;  %v812_v16 = vadd.f32 %v1658_v5, %v811_v15 }
 0x286   :  { %v1191_v17 = vpop.f32.mrf.mxu0 }
 0x287   :  { %926 = vst [vmem:[#allocation2 + $0x20] sm:$0xff] %v812_v16  ;;  %v823_v18 = vadd.f32 %v1191_v17, %v1658_v5 }
 0x288   :  { %v814_v19 = vpop.f32.mrf.mxu0 }
 0x289   :  { %929 = vst [vmem:[#allocation2 + $0x38] sm:$0xff] %v823_v18  ;;  %v815_v21 = vadd.f32 %v1658_v5, %v814_v19 }
 0x28a   :  { %v1194_v22 = vpop.f32.mrf.mxu0 }
 0x28b   :  { %927 = vst [vmem:[#allocation2 + $0x28] sm:$0xff] %v815_v21  ;;  %v836_v23 = vadd.f32 %v1194_v22, %v1658_v5 }
 0x28c   :  { %v827_v24 = vpop.f32.mrf.mxu0 }
 0x28d   :  { %932 = vst [vmem:[#allocation2 + $0x50] sm:$0xff] %v836_v23  ;;  %v828_v25 = vadd.f32 %v1658_v5, %v827_v24 }
 0x28e   :  { %v1195_v26 = vpop.f32.mrf.mxu0 }
 0x28f   :  { %930 = vst [vmem:[#allocation2 + $0x40] sm:$0xff] %v828_v25  ;;  %v839_v27 = vadd.f32 %v1195_v26, %v1658_v5 }
 0x290   :  { %v830_v28 = vpop.f32.mrf.mxu0 }
 0x291   :  { %933 = vst [vmem:[#allocation2 + $0x58] sm:$0xff] %v839_v27  ;;  %v831_v30 = vadd.f32 %v1658_v5, %v830_v28 }
 0x292   :  { %v1198_v31 = vpop.f32.mrf.mxu0 }
 0x293   :  { %931 = vst [vmem:[#allocation2 + $0x48] sm:$0xff] %v831_v30  ;;  %v852_v32 = vadd.f32 %v1198_v31, %v1658_v5 }
 0x294   :  { %v843_v33 = vpop.f32.mrf.mxu0 }
 0x295   :  { %936 = vst [vmem:[#allocation2 + $0x70] sm:$0xff] %v852_v32  ;;  %v844_v34 = vadd.f32 %v1658_v5, %v843_v33 }
 0x296   :  { %v1199_v35 = vpop.f32.mrf.mxu0 }
 0x297   :  { %934 = vst [vmem:[#allocation2 + $0x60] sm:$0xff] %v844_v34  ;;  %v855_v36 = vadd.f32 %v1199_v35, %v1658_v5 }
 0x298   :  { %v846_v37 = vpop.f32.mrf.mxu0 }
 0x299   :  { %937 = vst [vmem:[#allocation2 + $0x78] sm:$0xff] %v855_v36  ;;  %v847_v38 = vadd.f32 %v1658_v5, %v846_v37 }
 0x29a   :  { %v1202_v39 = vpop.f32.mrf.mxu0 }
 0x29b   :  { %935 = vst [vmem:[#allocation2 + $0x68] sm:$0xff] %v847_v38  ;;  %v868_v40 = vadd.f32 %v1202_v39, %v1658_v5 }
 0x29c   :  { %v859_v41 = vpop.f32.mrf.mxu0 }
 0x29d   :  { %940 = vst [vmem:[#allocation2 + $0x90] sm:$0xff] %v868_v40  ;;  %v860_v42 = vadd.f32 %v1658_v5, %v859_v41 }
 0x29e   :  { %v1203_v43 = vpop.f32.mrf.mxu0 }
 0x29f   :  { %938 = vst [vmem:[#allocation2 + $0x80] sm:$0xff] %v860_v42  ;;  %v871_v44 = vadd.f32 %v1203_v43, %v1658_v5 }
 0x2a0   :  { %v862_v45 = vpop.f32.mrf.mxu0 }
 0x2a1   :  { %941 = vst [vmem:[#allocation2 + $0x98] sm:$0xff] %v871_v44  ;;  %v863_v46 = vadd.f32 %v1658_v5, %v862_v45 }
 0x2a2   :  { %v1206_v47 = vpop.f32.mrf.mxu0 }
 0x2a3   :  { %939 = vst [vmem:[#allocation2 + $0x88] sm:$0xff] %v863_v46  ;;  %v884_v48 = vadd.f32 %v1206_v47, %v1658_v5 }
 0x2a4   :  { %v875_v49 = vpop.f32.mrf.mxu0 }
 0x2a5   :  { %944 = vst [vmem:[#allocation2 + $0xb0] sm:$0xff] %v884_v48  ;;  %v876_v50 = vadd.f32 %v1658_v5, %v875_v49 }
 0x2a6   :  { %v1207_v51 = vpop.f32.mrf.mxu0 }
 0x2a7   :  { %942 = vst [vmem:[#allocation2 + $0xa0] sm:$0xff] %v876_v50  ;;  %v887_v52 = vadd.f32 %v1207_v51, %v1658_v5 }
 0x2a8   :  { %v878_v53 = vpop.f32.mrf.mxu0 }
 0x2a9   :  { %945 = vst [vmem:[#allocation2 + $0xb8] sm:$0xff] %v887_v52  ;;  %v879_v54 = vadd.f32 %v1658_v5, %v878_v53 }
 0x2aa   :  { %v1210_v55 = vpop.f32.mrf.mxu0 }
 0x2ab   :  { %943 = vst [vmem:[#allocation2 + $0xa8] sm:$0xff] %v879_v54  ;;  %v900_v56 = vadd.f32 %v1210_v55, %v1658_v5 }
 0x2ac   :  { %v891_v57 = vpop.f32.mrf.mxu0 }
 0x2ad   :  { %948 = vst [vmem:[#allocation2 + $0xd0] sm:$0xff] %v900_v56  ;;  %v892_v58 = vadd.f32 %v1658_v5, %v891_v57 }
 0x2ae   :  { %v1211_v59 = vpop.f32.mrf.mxu0 }
 0x2af   :  { %946 = vst [vmem:[#allocation2 + $0xc0] sm:$0xff] %v892_v58  ;;  %v903_v60 = vadd.f32 %v1211_v59, %v1658_v5 }
 0x2b0   :  { %v894_v61 = vpop.f32.mrf.mxu0 }
 0x2b1   :  { %949 = vst [vmem:[#allocation2 + $0xd8] sm:$0xff] %v903_v60  ;;  %v895_v62 = vadd.f32 %v1658_v5, %v894_v61 }
 0x2b2   :  { %v1214_v63 = vpop.f32.mrf.mxu0 }
 0x2b3   :  { %947 = vst [vmem:[#allocation2 + $0xc8] sm:$0xff] %v895_v62  ;;  %v916_v0 = vadd.f32 %v1214_v63, %v1658_v5 }
 0x2b4   :  { %v907_v1 = vpop.f32.mrf.mxu0 }
 0x2b5   :  { %952 = vst [vmem:[#allocation2 + $0xf0] sm:$0xff] %v916_v0  ;;  %v908_v2 = vadd.f32 %v1658_v5, %v907_v1 }
 0x2b6   :  { %v1215_v3 = vpop.f32.mrf.mxu0 }
 0x2b7   :  { %950 = vst [vmem:[#allocation2 + $0xe0] sm:$0xff] %v908_v2  ;;  %v919_v20 = vadd.f32 %v1215_v3, %v1658_v5 }
 0x2b8   :  { %v910_v4 = vpop.f32.mrf.mxu0 }
 0x2b9   :  { %953 = vst [vmem:[#allocation2 + $0xf8] sm:$0xff] %v919_v20  ;;  %v911_v6 = vadd.f32 %v1658_v5, %v910_v4 }
 0x2bb   :  { %951 = vst [vmem:[#allocation2 + $0xe8] sm:$0xff] %v911_v6 }
 0x2bc   :  { %1394 = shalt.err (!%p1391_p4)
}
 0x2bd   :  { %s1406_s20 = smov 128   ;;  %s1407_s21 = smov 8  }
 0x2be   :  { %965 = dma.vmem_to_hbm [thread:$0]  %s960_s19, 4096, %s1702_s7, [#allocation3], %s1406_s20, %s1406_s20, %s1407_s21  }
 0x2bf   :  { %1403 = dma.done.wait [#allocation3], 4096  }
 0x2c0   :  { %1404 = vsyncadd [#allocation3], 4294963200 }
 0x2c1   :  { %969 = vsyncpa [#allocation3], 1 }

</bundles_post_ra>
